<compile_context>
chip_gen: v6e
topology: v6e:2x2x1
jax: 0.10.0
libtpu: 0.0.40
codegen_flags: <defaults>
</compile_context>

<pallas_src>
import numpy as np
import jax
import jax.numpy as jnp
from jax.experimental import pallas as pl
from jax.experimental.pallas import tpu as pltpu

# ----- snake_config constants -----
RO = 4.0
INIT_POLY_NUM = 40
POLY_NUM = 128
ADJ_NUM = 4
KSIZE = 2 * ADJ_NUM + 1            # 9-tap circular conv
STATE_DIM = 128
FEATURE_DIM = 64 + 2               # 66 real input channels to each Snake
PAD_DIM = 128                      # zero-padded to 128 lanes (padded weight rows = 0)
RES_LAYERS = 7
N_STATES = RES_LAYERS + 1          # 8 states feed the fusion / prediction convs
DILATIONS = (1, 1, 1, 2, 2, 4, 4)
FUSION_DIM = 256
PRED_DIM = 256
# eval-mode BatchNorm1d with default stats (gamma=1, beta=0, mean=0, var=1)
BN_SCALE = float(1.0 / np.sqrt(1.0 + 1e-5))


# ---------------------------------------------------------------------------
# pltpu.roll sign probe (one tiny kernel, run once at import) -- addresses the
# review's correctness concern about the roll direction.
# ---------------------------------------------------------------------------
def _probe_roll_matches_jnp():
    """True iff pltpu.roll(x, s, 0)[t] == x[(t - s) % L] (jnp.roll semantics)."""
    def kern(x_ref, o_ref):
        o_ref[...] = pltpu.roll(x_ref[...], 1, 0)
    x = jnp.arange(8 * 128, dtype=jnp.float32).reshape(8, 128)
    y = pl.pallas_call(kern, out_shape=jax.ShapeDtypeStruct((8, 128), jnp.float32))(x)
    return bool(y[0, 0] == x[7, 0])


_ROLL_IS_JNP = _probe_roll_matches_jnp()


def _rows_at_offset(v, off, length):
    """w[t] = v[(t + off) % length] along axis 0 (circular conv tap), on the XLU."""
    s = off % length
    if s == 0:
        return v
    shift = (length - s) if _ROLL_IS_JNP else s
    return pltpu.roll(v, shift, 0)


# ---------------------------------------------------------------------------
# Pallas kernel: one Snake GCN applied to a block of P polygons
# ---------------------------------------------------------------------------
def snake_kernel(x_ref, head_w, head_b, res_w, res_b, fus_w, fus_b,
                 p1g_w, p1s_w, p1_b, p2_w, p2_b, p3_w, p3_b, out_ref):
    """x_ref: (P, L, 128) f32 padded snake input -> out_ref: (P, L, 2) offsets."""
    P, L, C = x_ref.shape
    M = P * L
    f32, bf16 = jnp.float32, jnp.bfloat16

    def tap_rows(v, off):
        # per-polygon circular gather along the point axis of an (M, Cout) slab
        if off % L == 0:
            return v
        if P == 1:
            return _rows_at_offset(v, off, L)
        return jnp.concatenate(
            [_rows_at_offset(v[p * L:(p + 1) * L], off, L) for p in range(P)],
            axis=0)

    def circ_conv(xb, tap_w, bias, dilation):
        # y[t] = sum_k x[(t + (k - ADJ_NUM) * dilation) % L] @ W_k + b
        # The circular shift commutes with the row-wise matmul, so matmul first
        # (M = P*L rows fill the MXU) and rotate the f32 product on the XLU.
        acc = None
        for k in range(KSIZE):
            off = (k - ADJ_NUM) * dilation
            prod = jnp.dot(xb, tap_w(k), preferred_element_type=f32)
            prod = tap_rows(prod, off)
            acc = prod if acc is None else acc + prod
        return acc + bias

    # head BasicBlock: circular conv -> relu -> BN(eval, identity stats)
    xb = x_ref[...].reshape(M, C).astype(bf16)
    x = jnp.maximum(circ_conv(xb, lambda k: head_w[k], head_b[...], 1), 0.0) * BN_SCALE

    # residual dilated BasicBlocks; fusion-conv and prediction-conv contributions
    # of each state are accumulated incrementally (no states list / lane concats).
    fused_acc = jnp.zeros((M, FUSION_DIM), f32)
    p1_acc = jnp.zeros((M, PRED_DIM), f32)
    for i in range(N_STATES):
        xb = x.astype(bf16)
        fused_acc = fused_acc + jnp.dot(xb, fus_w[i], preferred_element_type=f32)
        p1_acc = p1_acc + jnp.dot(xb, p1s_w[i], preferred_element_type=f32)
        if i < RES_LAYERS:
            y = circ_conv(xb, lambda k, i=i: res_w[i, k], res_b[i], DILATIONS[i])
            x = jnp.maximum(y, 0.0) * BN_SCALE + x          # residual add in f32

    # fusion 1x1 conv bias + global max pool over each polygon's points
    fused = fused_acc + fus_b[...]                          # (M, 256)
    if P == 1:
        g = jnp.max(fused, axis=0, keepdims=True)           # (1, 256)
    else:
        g = jnp.concatenate(
            [jnp.max(fused[p * L:(p + 1) * L], axis=0, keepdims=True)
             for p in range(P)], axis=0)                    # (P, 256)

    # prediction head.  The global-branch rows are identical per polygon, so the
    # K=256 slice of p1 is computed once per polygon and broadcast-added.
    gcon = jnp.dot(g.astype(bf16), p1g_w[...], preferred_element_type=f32)   # (P, 256)
    if P == 1:
        h = p1_acc + gcon + p1_b[...]
    else:
        h = jnp.concatenate(
            [p1_acc[p * L:(p + 1) * L] + gcon[p:p + 1] for p in range(P)],
            axis=0) + p1_b[...]
    h = jnp.maximum(h, 0.0)
    h = jnp.maximum(
        jnp.dot(h.astype(bf16), p2_w[...], preferred_element_type=f32) + p2_b[...],
        0.0)
    o = jnp.dot(h.astype(bf16), p3_w[...], preferred_element_type=f32) + p3_b[...]

    o = o.astype(out_ref.dtype)
    for p in range(P):
        out_ref[p] = o[p * L:(p + 1) * L]


# ---------------------------------------------------------------------------
# pallas_call wrapper
# ---------------------------------------------------------------------------
_SNAKE_PARAM_ORDER = ('head_w', 'head_b', 'res_w', 'res_b', 'fus_w', 'fus_b',
                      'p1g_w', 'p1s_w', 'p1_b', 'p2_w', 'p2_b', 'p3_w', 'p3_b')


def _full_spec(shape):
    nd = len(shape)
    return pl.BlockSpec(shape, lambda i, _nd=nd: (0,) * _nd)


def _pick_poly_block(n):
    """Polygons per grid step: batch to fill the MXU rows (M = P*L) while keeping
    >= 2 grid steps so the "parallel" axis can split across v7x's two TensorCores."""
    for p in (8, 4, 2):
        if n % p == 0 and n // p >= 2:
            return p
    return 1


def run_snake(snake_params, x):
    """x: (N, L, 128) float32 padded snake input -> per-point offsets (N, L, 2)."""
    N, L, C = x.shape
    P = _pick_poly_block(N)
    ws = [snake_params[k] for k in _SNAKE_PARAM_ORDER]
    return pl.pallas_call(
        snake_kernel,
        out_shape=jax.ShapeDtypeStruct((N, L, 2), jnp.float32),
        grid=(N // P,),
        in_specs=[pl.BlockSpec((P, L, C), lambda i: (i, 0, 0))]
                 + [_full_spec(w.shape) for w in ws],
        out_specs=pl.BlockSpec((P, L, 2), lambda i: (i, 0, 0)),
        compiler_params=pltpu.CompilerParams(
            dimension_semantics=("parallel",),
            # bf16 weights ~3.5 MiB (~7 MiB double-buffered) + activations;
            # 32 MiB leaves headroom even on v7x's 64 MiB VMEM (was 64 MiB).
            vmem_limit_bytes=32 * 1024 * 1024),
    )(x, *ws)


# ---------------------------------------------------------------------------
# JAX glue (sampling, canonicalisation, orchestration)
# ---------------------------------------------------------------------------
def get_gcn_feature(cnn_feature, img_poly, ind):
    """Bilinear sample cnn_feature (NCHW) at image-space polygon points.

    Equivalent to snake_gcn_utils.get_gcn_feature: coords normalised by x/(w/2)-1
    then torch.grid_sample(mode='bilinear', padding_mode='zeros',
    align_corners=False), i.e. sample at pixel coordinate (x-0.5, y-0.5) with
    zero padding.  Returns (N, C, L).
    """
    B, C, H, W = cnn_feature.shape
    N, L, _ = img_poly.shape
    feats = cnn_feature[ind]                      # (N, C, H, W)
    flat = feats.reshape(N, C, H * W)
    px = img_poly[..., 0] - 0.5
    py = img_poly[..., 1] - 0.5
    x0f = jnp.floor(px)
    y0f = jnp.floor(py)
    wx1 = px - x0f
    wx0 = 1.0 - wx1
    wy1 = py - y0f
    wy0 = 1.0 - wy1
    x0 = x0f.astype(jnp.int32)
    y0 = y0f.astype(jnp.int32)

    def corner(xi, yi):
        valid = ((xi >= 0) & (xi < W) & (yi >= 0) & (yi < H)).astype(cnn_feature.dtype)
        xc = jnp.clip(xi, 0, W - 1)
        yc = jnp.clip(yi, 0, H - 1)
        idx = (yc * W + xc)[:, None, :]                            # (N, 1, L)
        v = jnp.take_along_axis(flat, jnp.broadcast_to(idx, (N, C, L)), axis=2)
        return v * valid[:, None, :]

    v00 = corner(x0, y0)
    v10 = corner(x0 + 1, y0)
    v01 = corner(x0, y0 + 1)
    v11 = corner(x0 + 1, y0 + 1)
    return (v00 * (wx0 * wy0)[:, None, :] + v10 * (wx1 * wy0)[:, None, :]
            + v01 * (wx0 * wy1)[:, None, :] + v11 * (wx1 * wy1)[:, None, :])


def img_poly_to_can_poly(img_poly):
    return img_poly - jnp.min(img_poly, axis=1, keepdims=True)


def _pad_channels(x):
    return jnp.pad(x, ((0, 0), (0, 0), (0, PAD_DIM - x.shape[-1])))


def init_poly(snake_params, fuse_w, fuse_b, cnn_feature, i_it_poly, c_it_poly, ind):
    feat = get_gcn_feature(cnn_feature, i_it_poly, ind)              # (N, 64, L)
    center = 0.5 * (jnp.min(i_it_poly, axis=1) + jnp.max(i_it_poly, axis=1))   # (N, 2)
    ct_feat = get_gcn_feature(cnn_feature, center[:, None, :], ind)  # (N, 64, 1)
    feat_t = jnp.transpose(feat, (0, 2, 1))                          # (N, L, 64)
    ct_t = jnp.transpose(ct_feat, (0, 2, 1))                         # (N, 1, 64)
    # Evolution.fuse (1x1 Conv1d, 128->64) split over the [poly-feat | ct-feat]
    # channel halves; the ct half is a per-polygon row, so no (N,64,L) broadcast
    # or channel concat is materialised.  Tiny matmul -> plain XLA einsum.
    fused = (jnp.einsum('nlc,cd->nld', feat_t, fuse_w[:64])
             + jnp.einsum('nlc,cd->nld', ct_t, fuse_w[64:])
             + fuse_b)                                               # (N, L, 64)
    snake_in = jnp.concatenate([fused, c_it_poly], axis=2)           # (N, L, 66)
    offsets = run_snake(snake_params, _pad_channels(snake_in))       # (N, L, 2) [Pallas]
    i_poly = i_it_poly + offsets
    return i_poly[:, ::INIT_POLY_NUM // 4]                           # (N, 4, 2)


def evolve_poly(snake_params, cnn_feature, i_it_poly, c_it_poly, ind):
    feat = get_gcn_feature(cnn_feature, i_it_poly, ind)              # (N, 64, L)
    x = jnp.transpose(feat, (0, 2, 1))                               # NLC
    snake_in = jnp.concatenate([x, c_it_poly * RO], axis=2)          # (N, L, 66)
    offsets = run_snake(snake_params, _pad_channels(snake_in))       # (N, L, 2) [Pallas]
    return i_it_poly * RO + offsets


def evolution_forward(params, cnn_feature, i_it_4py, c_it_4py, i_it_py, c_it_py, ind):
    """Training-branch compute of Evolution.forward, starting from prepared polys."""
    ex_pred = init_poly(params['init_gcn'], params['fuse_w'], params['fuse_b'],
                        cnn_feature, i_it_4py, c_it_4py, ind)
    py_pred = evolve_poly(params['evolve_gcn'], cnn_feature, i_it_py, c_it_py, ind)
    py_preds = [py_pred]
    for i in range(2):                                               # self.iter = 2
        py_pred = py_pred / RO
        c_py = img_poly_to_can_poly(py_pred)
        py_pred = evolve_poly(params['evolve_gcn' + str(i)], cnn_feature, py_pred, c_py, ind)
        py_preds.append(py_pred)
    return ex_pred, py_preds


# ---------------------------------------------------------------------------
# Deterministic parameter init (conv weights ~ N(0, 0.01^2), biases = 0).
# Matmul weights are stored bf16 (MXU-native); biases stay f32.  A PyTorch
# checkpoint's (Cout, Cin, 1) Conv1d weights map here via transpose + reshape.
# ---------------------------------------------------------------------------
def init_snake_params(key):
    ks = jax.random.split(key, 6)
    std = 0.01
    bf16 = jnp.bfloat16
    head_w = jnp.zeros((KSIZE, PAD_DIM, STATE_DIM), jnp.float32)
    head_w = head_w.at[:, :FEATURE_DIM, :].set(
        std * jax.random.normal(ks[0], (KSIZE, FEATURE_DIM, STATE_DIM), jnp.float32))
    p1_w = std * jax.random.normal(ks[3], (STATE_DIM * N_STATES + FUSION_DIM, PRED_DIM),
                                   jnp.float32)
    return {
        'head_w': head_w.astype(bf16),                                      # (9,128,128)
        'head_b': jnp.zeros((1, STATE_DIM), jnp.float32),
        'res_w': (std * jax.random.normal(
            ks[1], (RES_LAYERS, KSIZE, STATE_DIM, STATE_DIM), jnp.float32)).astype(bf16),
        'res_b': jnp.zeros((RES_LAYERS, 1, STATE_DIM), jnp.float32),
        'fus_w': (std * jax.random.normal(
            ks[2], (STATE_DIM * N_STATES, FUSION_DIM), jnp.float32)
                  ).reshape(N_STATES, STATE_DIM, FUSION_DIM).astype(bf16),  # (8,128,256)
        'fus_b': jnp.zeros((1, FUSION_DIM), jnp.float32),
        'p1g_w': p1_w[:FUSION_DIM].astype(bf16),                            # (256,256)
        'p1s_w': p1_w[FUSION_DIM:].reshape(N_STATES, STATE_DIM, PRED_DIM).astype(bf16),
        'p1_b': jnp.zeros((1, PRED_DIM), jnp.float32),
        'p2_w': (std * jax.random.normal(ks[4], (PRED_DIM, 64), jnp.float32)).astype(bf16),
        'p2_b': jnp.zeros((1, 64), jnp.float32),
        'p3_w': (std * jax.random.normal(ks[5], (64, 2), jnp.float32)).astype(bf16),
        'p3_b': jnp.zeros((1, 2), jnp.float32),
    }


def init_evolution_params(key):
    k_fuse, k0, k1, k2, k3 = jax.random.split(key, 5)
    return {
        'fuse_w': 0.01 * jax.random.normal(k_fuse, (128, 64), jnp.float32),
        'fuse_b': jnp.zeros((1, 64), jnp.float32),
        'init_gcn': init_snake_params(k0),
        'evolve_gcn': init_snake_params(k1),
        'evolve_gcn0': init_snake_params(k2),
        'evolve_gcn1': init_snake_params(k3),
    }


# ---------------------------------------------------------------------------
if __name__ == "__main__":
    key = jax.random.PRNGKey(0)
    kp, kf, k4, kpy = jax.random.split(key, 4)
    params = init_evolution_params(kp)

    B, C, H, W = 2, 64, 16, 16
    cnn_feature = jax.random.normal(kf, (B, C, H, W), jnp.float32)

    N = 4                                           # two polygons per image
    ind = jnp.array([0, 0, 1, 1], dtype=jnp.int32)
    i_it_4py = jax.random.uniform(k4, (N, INIT_POLY_NUM, 2), jnp.float32, 1.0, 15.0)
    c_it_4py = img_poly_to_can_poly(i_it_4py)
    i_it_py = jax.random.uniform(kpy, (N, POLY_NUM, 2), jnp.float32, 1.0, 15.0)
    c_it_py = img_poly_to_can_poly(i_it_py)

    fwd = jax.jit(evolution_forward)
    ex_pred, py_preds = fwd(params, cnn_feature, i_it_4py, c_it_4py, i_it_py, c_it_py, ind)
    (ex_pred, py_preds) = jax.block_until_ready((ex_pred, py_preds))

    assert ex_pred.shape == (N, 4, 2)
    assert len(py_preds) == 3 and all(p.shape == (N, POLY_NUM, 2) for p in py_preds)
    assert all(bool(jnp.all(jnp.isfinite(p))) for p in [ex_pred] + py_preds)
    print("KERNEL_OK")
</pallas_src>

<mosaic_0001>
module attributes {stable_mosaic.version = 11 : i64} {
  func.func @kern(%arg0: memref<8x128xf32, #tpu.memory_space<vmem>>, %arg1: memref<8x128xf32, #tpu.memory_space<vmem>>) attributes {dimension_semantics = [], scalar_prefetch = 0 : i64, scratch_operands = 0 : i64, tpu.core_type = #tpu.core_type<tc>} {
    %c0 = arith.constant 0 : index
    %c0_0 = arith.constant 0 : index
    %0 = vector.load %arg0[%c0, %c0_0] : memref<8x128xf32, #tpu.memory_space<vmem>>, vector<8x128xf32>
    %c1_i32 = arith.constant 1 : i32
    %1 = tpu.dynamic_rotate %0 by %c1_i32 dim 0 : vector<8x128xf32>, i32 -> vector<8x128xf32>
    %c0_1 = arith.constant 0 : index
    %c0_2 = arith.constant 0 : index
    %2 = vector.load %arg1[%c0_1, %c0_2] : memref<8x128xf32, #tpu.memory_space<vmem>>, vector<8x128xf32>
    tpu.vector_store %arg1[%c0_1, %c0_2], %1 {strides = array<i32>} : memref<8x128xf32, #tpu.memory_space<vmem>>, vector<8x128xf32>,
    return
  }
}

</mosaic_0001>

<bundles_post_ra>
// kernel: tpu_custom_call.1
= control target key start
LH: loop header
LB: loop body
LE: loop exit
PB: predicated region body
PF: predicated region fallthrough
CT: control target
= control target key end

     0   :  { %6 = vsyncpa [#allocation3], 0  ;;  %s103_s0 = inlined_call_operand.hbm [shape: f32[8,128], index: 0, kind: input, shape index: {}]   ;;  %s104_s1 = inlined_call_operand.hbm [shape: f32[8,128], index: 1, kind: output, shape index: {}]  }
   0x1   :  { %7 = vsyncpa [#allocation4], 0  ;;  %s85_s6 = smov [#allocation2]  }
   0x2   :  { %s14_s7 = sshll.u32 %s85_s6, 4  ;;  %s15_s7 = int_to_ptr.vmem [resolvable:$true] %s14_s7 }
   0x3   :  { %s49_s8 = scalar_lea.vmem %s15_s7, 128  ;;  %p54_p1 = scmp.lt.s32.totalorder %s15_s7, %s15_s7 }
   0x4   :  { %p50_p0 = scmp.ne.s32.totalorder %s15_s7, %s49_s8  ;;  %p55_p2 = scmp.lt.s32.totalorder %s49_s8, %s49_s8 }
   0x6   :  { %p56_p3 = por %p55_p2, %p54_p1 }
   0x8   :  { %p57_p4 = pnand %p56_p3, %p50_p0 }
   0xa   :  { %60 = shalt.err (!%p57_p4)
}
   0xb   :  { %17 = dma.hbm_to_vmem [thread:$0]  %s103_s0, 128, %s15_s7, [#allocation3]  }
   0xc   :  { %81 = dma.done.wait [#allocation3], 128  }
   0xd   :  { %82 = vsyncadd [#allocation3], 4294967168  ;;  %s86_s11 = smov [#allocation5]   ;;  %v21_v0 = vld [vmem:[#allocation2] sm:$0xff] }
   0xe   :  { %s30_s12 = sshll.u32 %s86_s11, 4  ;;  %v22_v1 = vrot.slane %v21_v0, 7  ;;  %s31_s12 = int_to_ptr.vmem [resolvable:$true] %s30_s12 }
   0xf   :  { %s61_s13 = scalar_lea.vmem %s31_s12, 128  ;;  %p66_p6 = scmp.lt.s32.totalorder %s31_s12, %s31_s12 }
  0x10   :  { %23 = vst [vmem:[#allocation5] sm:$0xff] %v22_v1  ;;  %p62_p5 = scmp.ne.s32.totalorder %s31_s12, %s61_s13  ;;  %p67_p7 = scmp.lt.s32.totalorder %s61_s13, %s61_s13 }
  0x12   :  { %p68_p8 = por %p67_p7, %p66_p6 }
  0x14   :  { %p69_p9 = pnand %p68_p8, %p62_p5 }
  0x16   :  { %72 = shalt.err (!%p69_p9)
}
  0x17   :  { %33 = dma.vmem_to_hbm [thread:$0]  %s31_s12, 128, %s104_s1, [#allocation4]  }
  0x18   :  { %83 = dma.done.wait [#allocation4], 128  }
  0x19   :  { %84 = vsyncadd [#allocation4], 4294967168 }
  0x1a   :  { %37 = vsyncpa [#allocation3], 1 }
  0x1b   :  { %38 = vsyncpa [#allocation4], 1 }

</bundles_post_ra>
